<compile_context>
chip_gen: v6e
topology: v6e:2x2x1
jax: 0.10.0
libtpu: 0.0.40
codegen_flags: <defaults>
</compile_context>

<pallas_src>
import functools

import jax
import jax.numpy as jnp
from jax.experimental import pallas as pl
from jax.experimental.pallas import tpu as pltpu

# Safe on v5e/v6e (128 MiB physical) and v7x (64 MiB physical).
_VMEM_LIMIT_BYTES = 32 * 1024 * 1024


def _pick_q_tile(n: int) -> int:
    """Largest query-row tile (multiple of 8, divides N) up to 256 rows."""
    for t in (256, 128, 64, 32, 16, 8):
        if n % t == 0:
            return t
    return n  # block == full array dim is always legal


# ------------------------------ fused kernel --------------------------------

def _fused_mha_kernel(xq_ref, xf_ref, wq_ref, bq_ref, wkv_ref, bkv_ref,
                      wp_ref, bp_ref, o_ref, *, num_heads, head_dim, emb_size):
    """One (batch, query-tile) cell: qkv proj -> attention -> out proj.

    xq_ref : (TQ, E) bf16   query-row tile of x
    xf_ref : (N,  E) bf16   full-sequence x (for K/V of this batch element)
    wq_ref : (E,  E) bf16 resident   bq_ref : (1, E)  f32
    wkv_ref: (E, 2E) bf16 resident   bkv_ref: (1, 2E) f32
    wp_ref : (E,  E) bf16 resident (already scaled by 1/sqrt(E))
    bp_ref : (1,  E) f32
    o_ref  : (TQ, E) f32   lane-dense output tile
    """
    H, D, E = num_heads, head_dim, emb_size
    xq = xq_ref[...]
    xf = xf_ref[...]

    # qkv projections: f32 MXU accumulation + f32 bias, kept bf16 thereafter
    # (the consumers -- energy / att@v matmuls -- take bf16 inputs anyway).
    q_all = (jnp.dot(xq, wq_ref[...], preferred_element_type=jnp.float32)
             + bq_ref[...]).astype(jnp.bfloat16)                  # (TQ, E)
    kv_all = (jnp.dot(xf, wkv_ref[...], preferred_element_type=jnp.float32)
              + bkv_ref[...]).astype(jnp.bfloat16)                # (N, 2E)

    # Heads: small H -> unrolled Python loop; each head's (TQ, N) temporaries
    # die as soon as its (TQ, D) output lands in `head_outs`.
    head_outs = []
    for h in range(H):
        q = q_all[:, h * D:(h + 1) * D]                           # (TQ, D)
        k = kv_all[:, h * D:(h + 1) * D]                          # (N,  D)
        v = kv_all[:, E + h * D:E + (h + 1) * D]                  # (N,  D)

        # energy[i, j] = q[i, :] . k[j, :] -- contract last dims, no explicit .T
        energy = jax.lax.dot_general(
            q, k, (((1,), (1,)), ((), ())),
            preferred_element_type=jnp.float32)                   # (TQ, N) f32

        # softmax over keys in f32.  (The reference's post-softmax 1/sqrt(E)
        # is folded into w_proj host-side.)  approx reciprocal runs on the EUP;
        # use approx=False if bit-level parity with PyTorch is required.
        m = jnp.max(energy, axis=-1, keepdims=True)
        e = jnp.exp(energy - m)
        inv = pl.reciprocal(jnp.sum(e, axis=-1, keepdims=True), approx=True)
        att = (e * inv).astype(jnp.bfloat16)

        head_outs.append(
            jnp.dot(att, v, preferred_element_type=jnp.float32))  # (TQ, D)

    # 'b h n d -> b n (h d)' is just a lane-dense concat (head-major layout).
    merged = jnp.concatenate(head_outs, axis=-1).astype(jnp.bfloat16)  # (TQ, E)

    # output projection; the ONLY store is the full lane-dense (TQ, E) tile.
    o_ref[...] = (jnp.dot(merged, wp_ref[...],
                          preferred_element_type=jnp.float32) + bp_ref[...])


# ------------------------------ Python wrapper -------------------------------

def multi_head_attention(x, prepared, num_heads):
    """Forward pass equivalent to the PyTorch MultiHeadAttention module."""
    B, N, E = x.shape
    D = E // num_heads
    TQ = _pick_q_tile(N)

    x_bf16 = x.astype(jnp.bfloat16)   # one host-side cast; halves HBM reads

    kernel = functools.partial(
        _fused_mha_kernel, num_heads=num_heads, head_dim=D, emb_size=E)

    out = pl.pallas_call(
        kernel,
        out_shape=jax.ShapeDtypeStruct((B, N, E), jnp.float32),
        grid=(B, N // TQ),
        in_specs=[
            # query-row tile of x
            pl.BlockSpec((None, TQ, E), lambda b, qi: (b, qi, 0)),
            # full-sequence x (for K/V) of the same batch element
            pl.BlockSpec((None, N, E), lambda b, qi: (b, 0, 0)),
            # resident bf16 weights / f32 biases
            pl.BlockSpec((E, E), lambda b, qi: (0, 0)),
            pl.BlockSpec((1, E), lambda b, qi: (0, 0)),
            pl.BlockSpec((E, 2 * E), lambda b, qi: (0, 0)),
            pl.BlockSpec((1, 2 * E), lambda b, qi: (0, 0)),
            pl.BlockSpec((E, E), lambda b, qi: (0, 0)),
            pl.BlockSpec((1, E), lambda b, qi: (0, 0)),
        ],
        out_specs=pl.BlockSpec((None, TQ, E), lambda b, qi: (b, qi, 0)),
        compiler_params=pltpu.CompilerParams(
            dimension_semantics=("parallel", "parallel"),
            vmem_limit_bytes=_VMEM_LIMIT_BYTES,
        ),
    )(x_bf16, x_bf16,
      prepared["w_q"], prepared["b_q"],
      prepared["w_kv"], prepared["b_kv"],
      prepared["w_proj"], prepared["b_proj"])
    return out


def prepare_params(params, num_heads):
    """Free host-side re-layout of the weights (done once).

    * qkv columns reordered from the interleaved '(h d qkv)' layout to
      [q | k | v] with head-major (h*D + d) order, then split into a Q part
      (E, E) and a KV part (E, 2E) so the kernel never slices weight refs.
    * the reference's post-softmax 1/sqrt(E) is folded into w_proj
      ((att/s) @ v @ Wp + bp == att @ v @ (Wp/s) + bp).
    * matmul weights cast to bf16 (f32 accumulation in-kernel); biases f32.
    """
    E = params["w_proj"].shape[0]
    H = num_heads
    D = E // H
    w_qkv = params["w_qkv"].reshape(E, H, D, 3)            # (E, h, d, qkv)
    b_qkv = params["b_qkv"].reshape(H, D, 3)
    w_r = jnp.transpose(w_qkv, (0, 3, 1, 2)).reshape(E, 3 * E)   # [q|k|v]
    b_r = jnp.transpose(b_qkv, (2, 0, 1)).reshape(3 * E)
    scaling = float(E) ** 0.5
    return {
        "w_q": w_r[:, :E].astype(jnp.bfloat16),
        "b_q": b_r[:E].astype(jnp.float32).reshape(1, E),
        "w_kv": w_r[:, E:].astype(jnp.bfloat16),
        "b_kv": b_r[E:].astype(jnp.float32).reshape(1, 2 * E),
        "w_proj": (params["w_proj"] / scaling).astype(jnp.bfloat16),
        "b_proj": params["b_proj"].astype(jnp.float32).reshape(1, E),
    }


# ------------------------------- entry point --------------------------------

if __name__ == "__main__":
    # Small shapes consistent with the module: emb_size must divide by heads.
    B, N, E, H = 2, 8, 32, 4

    key = jax.random.PRNGKey(0)
    kx, kwq, kbq, kwp, kbp = jax.random.split(key, 5)

    x = jax.random.normal(kx, (B, N, E), dtype=jnp.float32)

    params = {
        # nn.Linear(emb_size, emb_size * 3): stored transposed as (E, 3E)
        "w_qkv": jax.random.normal(kwq, (E, 3 * E), dtype=jnp.float32) * 0.02,
        "b_qkv": jax.random.normal(kbq, (3 * E,), dtype=jnp.float32) * 0.02,
        # nn.Linear(emb_size, emb_size)
        "w_proj": jax.random.normal(kwp, (E, E), dtype=jnp.float32) * 0.02,
        "b_proj": jax.random.normal(kbp, (E,), dtype=jnp.float32) * 0.02,
    }

    prepared = prepare_params(params, num_heads=H)
    out = multi_head_attention(x, prepared, num_heads=H)
    jax.block_until_ready(out)

    assert out.shape == (B, N, E), out.shape
    assert out.dtype == jnp.float32, out.dtype
    print("KERNEL_OK")
</pallas_src>

<mosaic_0001>
module attributes {stable_mosaic.version = 11 : i64} {
  func.func @_fused_mha_kernel(%arg0: i32, %arg1: i32, %arg2: memref<1x8x32xbf16, #tpu.memory_space<vmem>>, %arg3: memref<1x8x32xbf16, #tpu.memory_space<vmem>>, %arg4: memref<32x32xbf16, #tpu.memory_space<vmem>>, %arg5: memref<1x32xf32, #tpu.memory_space<vmem>>, %arg6: memref<32x64xbf16, #tpu.memory_space<vmem>>, %arg7: memref<1x64xf32, #tpu.memory_space<vmem>>, %arg8: memref<32x32xbf16, #tpu.memory_space<vmem>>, %arg9: memref<1x32xf32, #tpu.memory_space<vmem>>, %arg10: memref<1x8x32xf32, #tpu.memory_space<vmem>>) attributes {dimension_semantics = [#tpu.dimension_semantics<parallel>, #tpu.dimension_semantics<parallel>], iteration_bounds = array<i64: 2, 1>, scalar_prefetch = 0 : i64, scratch_operands = 0 : i64, tpu.core_type = #tpu.core_type<tc>, window_params = [{transform_indices = @transform_0, window_bounds = array<i64: 1, 8, 32>}, {transform_indices = @transform_1, window_bounds = array<i64: 1, 8, 32>}, {pipeline_mode = #tpu.pipeline_mode<synchronous>, transform_indices = @transform_2, window_bounds = array<i64: 32, 32>}, {pipeline_mode = #tpu.pipeline_mode<synchronous>, transform_indices = @transform_3, window_bounds = array<i64: 1, 32>}, {pipeline_mode = #tpu.pipeline_mode<synchronous>, transform_indices = @transform_4, window_bounds = array<i64: 32, 64>}, {pipeline_mode = #tpu.pipeline_mode<synchronous>, transform_indices = @transform_5, window_bounds = array<i64: 1, 64>}, {pipeline_mode = #tpu.pipeline_mode<synchronous>, transform_indices = @transform_6, window_bounds = array<i64: 32, 32>}, {pipeline_mode = #tpu.pipeline_mode<synchronous>, transform_indices = @transform_7, window_bounds = array<i64: 1, 32>}, {transform_indices = @transform_8, window_bounds = array<i64: 1, 8, 32>}]} {
    %c0 = arith.constant 0 : index
    %c0_0 = arith.constant 0 : index
    %c0_1 = arith.constant 0 : index
    %0 = vector.load %arg2[%c0, %c0_0, %c0_1] : memref<1x8x32xbf16, #tpu.memory_space<vmem>>, vector<1x8x32xbf16>
    %1 = vector.shape_cast %0 : vector<1x8x32xbf16> to vector<8x32xbf16>
    %c0_2 = arith.constant 0 : index
    %c0_3 = arith.constant 0 : index
    %c0_4 = arith.constant 0 : index
    %2 = vector.load %arg3[%c0_2, %c0_3, %c0_4] : memref<1x8x32xbf16, #tpu.memory_space<vmem>>, vector<1x8x32xbf16>
    %3 = vector.shape_cast %2 : vector<1x8x32xbf16> to vector<8x32xbf16>
    %c0_5 = arith.constant 0 : index
    %c0_6 = arith.constant 0 : index
    %4 = vector.load %arg4[%c0_5, %c0_6] : memref<32x32xbf16, #tpu.memory_space<vmem>>, vector<32x32xbf16>
    %cst = arith.constant dense<0.000000e+00> : vector<8x32xf32>
    %5 = tpu.matmul %1, %4, %cst {dimension_numbers = #tpu.dot_dimension_numbers<[1], [0], [0], [1], [0, 0, 1, 1], [], []>} : vector<8x32xbf16>, vector<32x32xbf16>, vector<8x32xf32> -> vector<8x32xf32>
    %c0_7 = arith.constant 0 : index
    %c0_8 = arith.constant 0 : index
    %6 = vector.load %arg5[%c0_7, %c0_8] : memref<1x32xf32, #tpu.memory_space<vmem>>, vector<1x32xf32>
    %7 = vector.broadcast %6 : vector<1x32xf32> to vector<8x32xf32>
    %8 = arith.addf %5, %7 : vector<8x32xf32>
    %9 = arith.truncf %8 : vector<8x32xf32> to vector<8x32xbf16>
    %c0_9 = arith.constant 0 : index
    %c0_10 = arith.constant 0 : index
    %10 = vector.load %arg6[%c0_9, %c0_10] : memref<32x64xbf16, #tpu.memory_space<vmem>>, vector<32x64xbf16>
    %cst_11 = arith.constant dense<0.000000e+00> : vector<8x64xf32>
    %11 = tpu.matmul %3, %10, %cst_11 {dimension_numbers = #tpu.dot_dimension_numbers<[1], [0], [0], [1], [0, 0, 1, 1], [], []>} : vector<8x32xbf16>, vector<32x64xbf16>, vector<8x64xf32> -> vector<8x64xf32>
    %c0_12 = arith.constant 0 : index
    %c0_13 = arith.constant 0 : index
    %12 = vector.load %arg7[%c0_12, %c0_13] : memref<1x64xf32, #tpu.memory_space<vmem>>, vector<1x64xf32>
    %13 = vector.broadcast %12 : vector<1x64xf32> to vector<8x64xf32>
    %14 = arith.addf %11, %13 : vector<8x64xf32>
    %15 = arith.truncf %14 : vector<8x64xf32> to vector<8x64xbf16>
    %16 = vector.extract_strided_slice %9 {offsets = [0, 0], sizes = [8, 8], strides = [1, 1]} : vector<8x32xbf16> to vector<8x8xbf16>
    %17 = vector.extract_strided_slice %15 {offsets = [0, 0], sizes = [8, 8], strides = [1, 1]} : vector<8x64xbf16> to vector<8x8xbf16>
    %18 = vector.extract_strided_slice %15 {offsets = [0, 32], sizes = [8, 8], strides = [1, 1]} : vector<8x64xbf16> to vector<8x8xbf16>
    %cst_14 = arith.constant dense<0.000000e+00> : vector<8x8xf32>
    %19 = tpu.matmul %16, %17, %cst_14 {dimension_numbers = #tpu.dot_dimension_numbers<[1], [1], [0], [0], [0, 0, 1, 0], [], []>} : vector<8x8xbf16>, vector<8x8xbf16>, vector<8x8xf32> -> vector<8x8xf32>
    %cst_15 = arith.constant dense<0xFF800000> : vector<8xf32>
    %20 = vector.multi_reduction <maximumf>, %19, %cst_15 [1] : vector<8x8xf32> to vector<8xf32>
    %21 = vector.shape_cast %20 : vector<8xf32> to vector<8x1xf32>
    %22 = vector.broadcast %21 : vector<8x1xf32> to vector<8x8xf32>
    %23 = arith.subf %19, %22 : vector<8x8xf32>
    %24 = math.exp %23 : vector<8x8xf32>
    %cst_16 = arith.constant dense<0.000000e+00> : vector<8xf32>
    %25 = vector.multi_reduction <add>, %24, %cst_16 [1] : vector<8x8xf32> to vector<8xf32>
    %26 = vector.shape_cast %25 : vector<8xf32> to vector<8x1xf32>
    %27 = tpu.reciprocal %26 {approx = true} : vector<8x1xf32> -> vector<8x1xf32>
    %28 = vector.broadcast %27 : vector<8x1xf32> to vector<8x8xf32>
    %29 = arith.mulf %24, %28 : vector<8x8xf32>
    %30 = arith.truncf %29 : vector<8x8xf32> to vector<8x8xbf16>
    %cst_17 = arith.constant dense<0.000000e+00> : vector<8x8xf32>
    %31 = tpu.matmul %30, %18, %cst_17 {dimension_numbers = #tpu.dot_dimension_numbers<[1], [0], [0], [1], [0, 0, 1, 1], [], []>} : vector<8x8xbf16>, vector<8x8xbf16>, vector<8x8xf32> -> vector<8x8xf32>
    %32 = vector.extract_strided_slice %9 {offsets = [0, 8], sizes = [8, 8], strides = [1, 1]} : vector<8x32xbf16> to vector<8x8xbf16>
    %33 = vector.extract_strided_slice %15 {offsets = [0, 8], sizes = [8, 8], strides = [1, 1]} : vector<8x64xbf16> to vector<8x8xbf16>
    %34 = vector.extract_strided_slice %15 {offsets = [0, 40], sizes = [8, 8], strides = [1, 1]} : vector<8x64xbf16> to vector<8x8xbf16>
    %cst_18 = arith.constant dense<0.000000e+00> : vector<8x8xf32>
    %35 = tpu.matmul %32, %33, %cst_18 {dimension_numbers = #tpu.dot_dimension_numbers<[1], [1], [0], [0], [0, 0, 1, 0], [], []>} : vector<8x8xbf16>, vector<8x8xbf16>, vector<8x8xf32> -> vector<8x8xf32>
    %cst_19 = arith.constant dense<0xFF800000> : vector<8xf32>
    %36 = vector.multi_reduction <maximumf>, %35, %cst_19 [1] : vector<8x8xf32> to vector<8xf32>
    %37 = vector.shape_cast %36 : vector<8xf32> to vector<8x1xf32>
    %38 = vector.broadcast %37 : vector<8x1xf32> to vector<8x8xf32>
    %39 = arith.subf %35, %38 : vector<8x8xf32>
    %40 = math.exp %39 : vector<8x8xf32>
    %cst_20 = arith.constant dense<0.000000e+00> : vector<8xf32>
    %41 = vector.multi_reduction <add>, %40, %cst_20 [1] : vector<8x8xf32> to vector<8xf32>
    %42 = vector.shape_cast %41 : vector<8xf32> to vector<8x1xf32>
    %43 = tpu.reciprocal %42 {approx = true} : vector<8x1xf32> -> vector<8x1xf32>
    %44 = vector.broadcast %43 : vector<8x1xf32> to vector<8x8xf32>
    %45 = arith.mulf %40, %44 : vector<8x8xf32>
    %46 = arith.truncf %45 : vector<8x8xf32> to vector<8x8xbf16>
    %cst_21 = arith.constant dense<0.000000e+00> : vector<8x8xf32>
    %47 = tpu.matmul %46, %34, %cst_21 {dimension_numbers = #tpu.dot_dimension_numbers<[1], [0], [0], [1], [0, 0, 1, 1], [], []>} : vector<8x8xbf16>, vector<8x8xbf16>, vector<8x8xf32> -> vector<8x8xf32>
    %48 = vector.extract_strided_slice %9 {offsets = [0, 16], sizes = [8, 8], strides = [1, 1]} : vector<8x32xbf16> to vector<8x8xbf16>
    %49 = vector.extract_strided_slice %15 {offsets = [0, 16], sizes = [8, 8], strides = [1, 1]} : vector<8x64xbf16> to vector<8x8xbf16>
    %50 = vector.extract_strided_slice %15 {offsets = [0, 48], sizes = [8, 8], strides = [1, 1]} : vector<8x64xbf16> to vector<8x8xbf16>
    %cst_22 = arith.constant dense<0.000000e+00> : vector<8x8xf32>
    %51 = tpu.matmul %48, %49, %cst_22 {dimension_numbers = #tpu.dot_dimension_numbers<[1], [1], [0], [0], [0, 0, 1, 0], [], []>} : vector<8x8xbf16>, vector<8x8xbf16>, vector<8x8xf32> -> vector<8x8xf32>
    %cst_23 = arith.constant dense<0xFF800000> : vector<8xf32>
    %52 = vector.multi_reduction <maximumf>, %51, %cst_23 [1] : vector<8x8xf32> to vector<8xf32>
    %53 = vector.shape_cast %52 : vector<8xf32> to vector<8x1xf32>
    %54 = vector.broadcast %53 : vector<8x1xf32> to vector<8x8xf32>
    %55 = arith.subf %51, %54 : vector<8x8xf32>
    %56 = math.exp %55 : vector<8x8xf32>
    %cst_24 = arith.constant dense<0.000000e+00> : vector<8xf32>
    %57 = vector.multi_reduction <add>, %56, %cst_24 [1] : vector<8x8xf32> to vector<8xf32>
    %58 = vector.shape_cast %57 : vector<8xf32> to vector<8x1xf32>
    %59 = tpu.reciprocal %58 {approx = true} : vector<8x1xf32> -> vector<8x1xf32>
    %60 = vector.broadcast %59 : vector<8x1xf32> to vector<8x8xf32>
    %61 = arith.mulf %56, %60 : vector<8x8xf32>
    %62 = arith.truncf %61 : vector<8x8xf32> to vector<8x8xbf16>
    %cst_25 = arith.constant dense<0.000000e+00> : vector<8x8xf32>
    %63 = tpu.matmul %62, %50, %cst_25 {dimension_numbers = #tpu.dot_dimension_numbers<[1], [0], [0], [1], [0, 0, 1, 1], [], []>} : vector<8x8xbf16>, vector<8x8xbf16>, vector<8x8xf32> -> vector<8x8xf32>
    %64 = vector.extract_strided_slice %9 {offsets = [0, 24], sizes = [8, 8], strides = [1, 1]} : vector<8x32xbf16> to vector<8x8xbf16>
    %65 = vector.extract_strided_slice %15 {offsets = [0, 24], sizes = [8, 8], strides = [1, 1]} : vector<8x64xbf16> to vector<8x8xbf16>
    %66 = vector.extract_strided_slice %15 {offsets = [0, 56], sizes = [8, 8], strides = [1, 1]} : vector<8x64xbf16> to vector<8x8xbf16>
    %cst_26 = arith.constant dense<0.000000e+00> : vector<8x8xf32>
    %67 = tpu.matmul %64, %65, %cst_26 {dimension_numbers = #tpu.dot_dimension_numbers<[1], [1], [0], [0], [0, 0, 1, 0], [], []>} : vector<8x8xbf16>, vector<8x8xbf16>, vector<8x8xf32> -> vector<8x8xf32>
    %cst_27 = arith.constant dense<0xFF800000> : vector<8xf32>
    %68 = vector.multi_reduction <maximumf>, %67, %cst_27 [1] : vector<8x8xf32> to vector<8xf32>
    %69 = vector.shape_cast %68 : vector<8xf32> to vector<8x1xf32>
    %70 = vector.broadcast %69 : vector<8x1xf32> to vector<8x8xf32>
    %71 = arith.subf %67, %70 : vector<8x8xf32>
    %72 = math.exp %71 : vector<8x8xf32>
    %cst_28 = arith.constant dense<0.000000e+00> : vector<8xf32>
    %73 = vector.multi_reduction <add>, %72, %cst_28 [1] : vector<8x8xf32> to vector<8xf32>
    %74 = vector.shape_cast %73 : vector<8xf32> to vector<8x1xf32>
    %75 = tpu.reciprocal %74 {approx = true} : vector<8x1xf32> -> vector<8x1xf32>
    %76 = vector.broadcast %75 : vector<8x1xf32> to vector<8x8xf32>
    %77 = arith.mulf %72, %76 : vector<8x8xf32>
    %78 = arith.truncf %77 : vector<8x8xf32> to vector<8x8xbf16>
    %cst_29 = arith.constant dense<0.000000e+00> : vector<8x8xf32>
    %79 = tpu.matmul %78, %66, %cst_29 {dimension_numbers = #tpu.dot_dimension_numbers<[1], [0], [0], [1], [0, 0, 1, 1], [], []>} : vector<8x8xbf16>, vector<8x8xbf16>, vector<8x8xf32> -> vector<8x8xf32>
    %80 = tpu.concatenate %31, %47, %63, %79 in 1 : vector<8x8xf32>, vector<8x8xf32>, vector<8x8xf32>, vector<8x8xf32> -> vector<8x32xf32>
    %81 = arith.truncf %80 : vector<8x32xf32> to vector<8x32xbf16>
    %c0_30 = arith.constant 0 : index
    %c0_31 = arith.constant 0 : index
    %82 = vector.load %arg8[%c0_30, %c0_31] : memref<32x32xbf16, #tpu.memory_space<vmem>>, vector<32x32xbf16>
    %cst_32 = arith.constant dense<0.000000e+00> : vector<8x32xf32>
    %83 = tpu.matmul %81, %82, %cst_32 {dimension_numbers = #tpu.dot_dimension_numbers<[1], [0], [0], [1], [0, 0, 1, 1], [], []>} : vector<8x32xbf16>, vector<32x32xbf16>, vector<8x32xf32> -> vector<8x32xf32>
    %c0_33 = arith.constant 0 : index
    %c0_34 = arith.constant 0 : index
    %84 = vector.load %arg9[%c0_33, %c0_34] : memref<1x32xf32, #tpu.memory_space<vmem>>, vector<1x32xf32>
    %85 = vector.broadcast %84 : vector<1x32xf32> to vector<8x32xf32>
    %86 = arith.addf %83, %85 : vector<8x32xf32>
    %c0_35 = arith.constant 0 : index
    %c0_36 = arith.constant 0 : index
    %c0_37 = arith.constant 0 : index
    %87 = vector.load %arg10[%c0_35, %c0_36, %c0_37] : memref<1x8x32xf32, #tpu.memory_space<vmem>>, vector<1x8x32xf32>
    %88 = vector.shape_cast %87 : vector<1x8x32xf32> to vector<8x32xf32>
    %89 = vector.shape_cast %86 : vector<8x32xf32> to vector<1x8x32xf32>
    tpu.vector_store %arg10[%c0_35, %c0_36, %c0_37], %89 {strides = array<i32>} : memref<1x8x32xf32, #tpu.memory_space<vmem>>, vector<1x8x32xf32>,
    return
  }
  func.func @transform_0(%arg0: i32, %arg1: i32) -> (i32, i32, i32) {
    %c0_i32 = arith.constant 0 : i32
    %c0_i32_0 = arith.constant 0 : i32
    return %arg0, %arg1, %c0_i32 : i32, i32, i32
  }
  func.func @transform_1(%arg0: i32, %arg1: i32) -> (i32, i32, i32) {
    %c0_i32 = arith.constant 0 : i32
    %c0_i32_0 = arith.constant 0 : i32
    %c0_i32_1 = arith.constant 0 : i32
    return %arg0, %c0_i32, %c0_i32_0 : i32, i32, i32
  }
  func.func @transform_2(%arg0: i32, %arg1: i32) -> (i32, i32) {
    %c0_i32 = arith.constant 0 : i32
    %c0_i32_0 = arith.constant 0 : i32
    %c0_i32_1 = arith.constant 0 : i32
    return %c0_i32, %c0_i32_0 : i32, i32
  }
  func.func @transform_3(%arg0: i32, %arg1: i32) -> (i32, i32) {
    %c0_i32 = arith.constant 0 : i32
    %c0_i32_0 = arith.constant 0 : i32
    %c0_i32_1 = arith.constant 0 : i32
    return %c0_i32, %c0_i32_0 : i32, i32
  }
  func.func @transform_4(%arg0: i32, %arg1: i32) -> (i32, i32) {
    %c0_i32 = arith.constant 0 : i32
    %c0_i32_0 = arith.constant 0 : i32
    %c0_i32_1 = arith.constant 0 : i32
    return %c0_i32, %c0_i32_0 : i32, i32
  }
  func.func @transform_5(%arg0: i32, %arg1: i32) -> (i32, i32) {
    %c0_i32 = arith.constant 0 : i32
    %c0_i32_0 = arith.constant 0 : i32
    %c0_i32_1 = arith.constant 0 : i32
    return %c0_i32, %c0_i32_0 : i32, i32
  }
  func.func @transform_6(%arg0: i32, %arg1: i32) -> (i32, i32) {
    %c0_i32 = arith.constant 0 : i32
    %c0_i32_0 = arith.constant 0 : i32
    %c0_i32_1 = arith.constant 0 : i32
    return %c0_i32, %c0_i32_0 : i32, i32
  }
  func.func @transform_7(%arg0: i32, %arg1: i32) -> (i32, i32) {
    %c0_i32 = arith.constant 0 : i32
    %c0_i32_0 = arith.constant 0 : i32
    %c0_i32_1 = arith.constant 0 : i32
    return %c0_i32, %c0_i32_0 : i32, i32
  }
  func.func @transform_8(%arg0: i32, %arg1: i32) -> (i32, i32, i32) {
    %c0_i32 = arith.constant 0 : i32
    %c0_i32_0 = arith.constant 0 : i32
    return %arg0, %arg1, %c0_i32 : i32, i32, i32
  }
}

</mosaic_0001>

<bundles_post_ra>
// kernel: tpu_custom_call.1
= control target key start
LH: loop header
LB: loop body
LE: loop exit
PB: predicated region body
PF: predicated region fallthrough
CT: control target
= control target key end

     0   :  { %s2092_s0 = inlined_call_operand.hbm [shape: bf16[2,8,32], index: 0, kind: input, shape index: {}]   ;;  %s2093_s1 = inlined_call_operand.hbm [shape: bf16[2,8,32], index: 1, kind: input, shape index: {}]   ;;  %s2094_s2 = inlined_call_operand.hbm [shape: bf16[32,32], index: 2, kind: input, shape index: {}]   ;;  %s2095_s3 = inlined_call_operand.vmem [shape: f32[1,32], index: 3, kind: input, shape index: {}]   ;;  %s2096_s4 = inlined_call_operand.hbm [shape: bf16[32,64], index: 4, kind: input, shape index: {}]   ;;  %s2097_s5 = inlined_call_operand.vmem [shape: f32[1,64], index: 5, kind: input, shape index: {}]   ;;  %s2098_s6 = inlined_call_operand.hbm [shape: bf16[32,32], index: 6, kind: input, shape index: {}]   ;;  %s2099_s7 = inlined_call_operand.vmem [shape: f32[1,32], index: 7, kind: input, shape index: {}]   ;;  %s2100_s8 = inlined_call_operand.hbm [shape: f32[2,8,32], index: 8, kind: output, shape index: {}]  }
   0x1   :  { %2105 = sst [smem:[#allocation19_spill]] %s2092_s0 }
   0x2   :  { %2106 = sst [smem:[#allocation20_spill]] %s2094_s2 }
   0x3   :  { %2107 = sst [smem:[#allocation21_spill]] %s2096_s4 }
   0x4   :  { %2108 = sst [smem:[#allocation22_spill]] %s2098_s6 }
   0x5   :  { %13 = vsyncpa [#allocation3], 0 }
   0x6   :  { %15 = vsyncpa [#allocation3 + $0x1], 0 }
   0x7   :  { %16 = vsyncpa [#allocation6], 0 }
   0x8   :  { %18 = vsyncpa [#allocation6 + $0x1], 0 }
   0x9   :  { %19 = vsyncpa [#allocation9], 0 }
   0xa   :  { %20 = vsyncpa [#allocation4], 0 }
   0xb   :  { %22 = vsyncpa [#allocation4 + $0x1], 0  ;;  %s1793_s27 = smov 0   ;;  %s1795_s28 = smov 0  }
   0xc   :  { %s1797_s29 = smov 0   ;;  %s1799_s30 = smov 0  }
   0xd   :  { %s1801_s9 = smov 0   ;;  %s1803_s10 = smov 0  }
   0xe LB: > { %s1824_s11 = sadd.s32 4294967295, %s1726_s10   ;;  %s1228_s12 = sadd.s32 4294967294, %s1726_s10   ;;  %s1726_s10 = sphi %s1803_s10, %s28_s10   ;;  %s1722_s9 = sphi %s1801_s9, %s2135_s9   ;;  %s1718_s30 = sphi %s1799_s30, %s2134_s30   ;;  %s1714_s29 = sphi %s1797_s29, %s2133_s29   ;;  %s1710_s28 = sphi %s1795_s28, %s2132_s28   ;;  %s1706_s27 = sphi %s1793_s27, %s2131_s27  }
   0xf   : > { %p62_p0 = scmp.ne.s32.totalorder %s1710_s28, %s1706_s27  ;;  %p2101_p1 = scmp.eq.s32.totalorder %s1824_s11, 0 }
  0x10   : > { %p246_p3 = scmp.eq.s32.totalorder %s1228_s12, 1  ;;  %p1229_p5 = scmp.ge.s32.totalorder %s1726_s10, 1 }
  0x11   : > { %p1833_p4 = por %p2101_p1, %p62_p0  ;;  %p253_p7 = scmp.lt.s32.totalorder %s1726_s10, 3 }
  0x12   : > { %p1838_p6 = por %p246_p3, %p62_p0  ;;  %s1728_s16 = smov [#allocation7]  }
  0x13   : > { %s2109_s13 = scalar_select %p1833_p4, 1, 0 }
  0x14   : > { %s2110_s14 = scalar_select %p1838_p6, 1, 0 }
  0x15   : > { %p1843_p8 = pnand %p1229_p5, %p253_p7  ;;  %s265_s17 = sshll.u32 %s1728_s16, 4  ;;  %s266_s17 = int_to_ptr.vmem [resolvable:$true] %s265_s17 }
  0x16   : > { %2111 = sst [smem:[#allocation17_spill]] %s2110_s14  ;;  %s1729_s19 = smov [#allocation8]  }
  0x17   : > { %p1384_p9 = pneg %p1843_p8  ;;  %s281_s20 = sshll.u32 %s1729_s19, 4  ;;  %s282_s20 = int_to_ptr.vmem [resolvable:$true] %s281_s20 }
  0x18   : > { %s1730_s21 = smov [#allocation10]   ;;  %s1511_s23 = scalar_lea.vmem %s266_s17, 256 }
  0x19   : > { %p1852_p11 = pnand %p1384_p9, %p2101_p1  ;;  %s297_s22 = sshll.u32 %s1730_s21, 4  ;;  %s298_s22 = int_to_ptr.vmem [resolvable:$true] %s297_s22 }
  0x1a   : > { %p1512_p13 = scmp.ne.s32.totalorder %s266_s17, %s1511_s23  ;;  %p1519_p5 = scmp.lt.s32.totalorder %s266_s17, %s266_s17 }
  0x1b   : > { %p1502_p12 = pneg %p1852_p11  ;;  %p1520_p7 = scmp.lt.s32.totalorder %s1511_s23, %s1511_s23 }
  0x1d   : > { %p1514_p0 = pnand %p1512_p13, %p1502_p12  ;;  %p1521_p9 = por %p1520_p7, %p1519_p5 }
  0x1f   : > { %p1515_p3 = pneg %p1514_p0 }
  0x21   : > { %p1522_p10 = pnand %p1521_p9, %p1515_p3 }
  0x23   : > { %1525 = shalt.err (!%p1522_p10)
}
  0x24   : > { %s1731_s24 = smov 64   ;;  %s1732_s25 = smov 4  }
  0x25   : > { %s2114_s2 = sld [smem:[#allocation20_spill]]  ;;  %s1537_s16 = scalar_lea.vmem %s282_s20, 256 }
  0x26   : > { %p1538_p1 = scmp.ne.s32.totalorder %s282_s20, %s1537_s16  ;;  %p1545_p2 = scmp.lt.s32.totalorder %s282_s20, %s282_s20 }
  0x27   : > { %p1546_p6 = scmp.lt.s32.totalorder %s1537_s16, %s1537_s16 }
  0x28   : > { %p1540_p13 = pnand %p1538_p1, %p1502_p12 }
  0x29   : > { %p1547_p5 = por %p1546_p6, %p1545_p2 }
  0x2a   : > { %p1541_p0 = pneg %p1540_p13 }
  0x2b   : > { %1387 = dma.hbm_to_vmem [thread:$0]  (!%p1852_p11), %s2114_s2, 256, %s266_s17, [#allocation6], %s1731_s24, %s1731_s24, %s1732_s25  }
  0x2c   : > { %p1548_p3 = pnand %p1547_p5, %p1541_p0 }
  0x2e   : > { %1551 = shalt.err (!%p1548_p3)
}
  0x2f   : > { %s2115_s4 = sld [smem:[#allocation21_spill]]  ;;  %s1563_s17 = scalar_lea.vmem %s298_s22, 256 }
  0x30   : > { %p1564_p10 = scmp.ne.s32.totalorder %s298_s22, %s1563_s17  ;;  %p1571_p9 = scmp.lt.s32.totalorder %s298_s22, %s298_s22 }
  0x31   : > { %p1572_p13 = scmp.lt.s32.totalorder %s1563_s17, %s1563_s17 }
  0x32   : > { %p1566_p7 = pnand %p1564_p10, %p1502_p12 }
  0x33   : > { %p1573_p4 = por %p1572_p13, %p1571_p9 }
  0x34   : > { %p1567_p1 = pneg %p1566_p7 }
  0x35   : > { %1390 = dma.hbm_to_vmem [thread:$0]  (!%p1852_p11), %s2115_s4, 256, %s282_s20, [#allocation9], %s1731_s24, %s1731_s24, %s1732_s25  }
  0x36   : > { %p1574_p2 = pnand %p1573_p4, %p1567_p1 }
  0x38   : > { %1577 = shalt.err (!%p1574_p2)
}
  0x39   : > { %s2116_s6 = sld [smem:[#allocation22_spill]]  ;;  %s49_s20 = sadd.s32 1, %s1714_s29 }
  0x3a   : > { %s40_s12 = sadd.s32 1, %s1722_s9  ;;  %p56_p4 = scmp.ne.s32.totalorder %s1714_s29, %s1710_s28 }
  0x3b   : > { %p42_p6 = scmp.ge.s32.totalorder %s40_s12, 2  ;;  %p57_p12 = scmp.eq.s32.totalorder %s1726_s10, 0 }
  0x3c   : > { %p2117_p0 = scmp.eq.s32.totalorder %s1824_s11, 1  ;;  %p1408_p3 = scmp.lt.s32.totalorder %s1726_s10, 2 }
  0x3d   : > { %s2137_s12 = smov (%p42_p6, %s40_s12), 0  ;;  %p58_p10 = por %p57_p12, %p56_p4 }
  0x3e   : > { %p1889_p5 = por %p2117_p0, %p56_p4  ;;  %2119 = sst [smem:[#allocation18_spill]] %s2137_s12 }
  0x3f   : > { %1393 = dma.hbm_to_vmem [thread:$0]  (!%p1852_p11), %s2116_s6, 256, %s298_s22, [#allocation9], %s1731_s24, %s1731_s24, %s1732_s25  }
  0x40   : > { %s314_s16 = sand.u32 1, %s1714_s29   ;;  %s44_s19 = ssub.s32 %s1722_s9, %s2137_s12 }
  0x41   : > { %p47_p11 = scmp.eq.s32.totalorder %s44_s19, 0  ;;  %s1234_s22 = sshll.u32 %s314_s16, 2 }
  0x42   : > { %s1235_s24 = sshll.u32 %s1722_s9, 6  ;;  %s2120_s0 = sld [smem:[#allocation19_spill]] }
  0x43   : > { %s1901_s25 = scalar_select %p47_p11, %s1714_s29, %s49_s20  }
  0x44   : > { %s318_s26 = scalar_lea.vmem [#allocation2], %s1234_s22  ;;  %p1908_p7 = pnand %p1408_p3, %p58_p10 }
  0x45   : > { %s326_s2 = sshll.u32 %s318_s26, 4  ;;  %s1915_s19 = scalar_lea.hbm %s2093_s1, %s1235_s24  ;;  %s327_s2 = int_to_ptr.vmem [resolvable:$true] %s326_s2 }
  0x46   : > { %s333_s20 = sand.u32 1, %s1726_s10   ;;  %s315_s12 = scalar_lea.sflag [#allocation3], %s314_s16 }
  0x47   : > { %p1580_p1 = pneg %p1908_p7  ;;  %s1591_s21 = scalar_lea.vmem %s327_s2, 64 }
  0x48   : > { %s324_s23 = scalar_lea.hbm %s2120_s0, %s1235_s24  ;;  %p1592_p9 = scmp.ne.s32.totalorder %s327_s2, %s1591_s21 }
  0x49   : > { %s1733_s17 = smov [#allocation2]  }
  0x4a   : > { %p1594_p13 = pnand %p1592_p9, %p1580_p1  ;;  %s1596_s26 = sshll.u32 %s1733_s17, 4  ;;  %s1597_s26 = int_to_ptr.vmem [resolvable:$false] %s1596_s26 }
  0x4b   : > { %s1598_s0 = scalar_lea.vmem %s1597_s26, 128  ;;  %p1599_p4 = scmp.lt.s32.totalorder %s327_s2, %s1597_s26 }
  0x4c   : > { %p1595_p2 = pneg %p1594_p13  ;;  %p1600_p6 = scmp.lt.s32.totalorder %s1598_s0, %s1591_s21 }
  0x4e   : > { %p1601_p12 = por %p1600_p6, %p1599_p4 }
  0x50   : > { %p1602_p0 = pnand %p1601_p12, %p1595_p2 }
  0x52   : > { %1605 = shalt.err (!%p1602_p0)
}
  0x53   : > { %1397 = dma.hbm_to_vmem [thread:$0]  (!%p1908_p7), %s324_s23, 64, %s327_s2, %s315_s12  }
  0x54   : > { %s337_s6 = scalar_lea.vmem [#allocation5], %s1234_s22  ;;  %s334_s16 = scalar_lea.sflag [#allocation6], %s333_s20 }
  0x55   : > { %s344_s14 = sshll.u32 %s337_s6, 4  ;;  %s1734_s17 = smov [#allocation5]   ;;  %s345_s14 = int_to_ptr.vmem [resolvable:$true] %s344_s14 }
  0x56   : > { %s1619_s24 = scalar_lea.vmem %s345_s14, 64  ;;  %s1624_s26 = sshll.u32 %s1734_s17, 4  ;;  %s1625_s26 = int_to_ptr.vmem [resolvable:$false] %s1624_s26 }
  0x57   : > { %p1620_p3 = scmp.ne.s32.totalorder %s345_s14, %s1619_s24  ;;  %s1626_s0 = scalar_lea.vmem %s1625_s26, 128 }
  0x58   : > { %p1627_p9 = scmp.lt.s32.totalorder %s345_s14, %s1625_s26  ;;  %p1628_p13 = scmp.lt.s32.totalorder %s1626_s0, %s1619_s24 }
  0x59   : > { %p1622_p10 = pnand %p1620_p3, %p1580_p1 }
  0x5a   : > { %p1629_p2 = por %p1628_p13, %p1627_p9 }
  0x5b   : > { %p1623_p11 = pneg %p1622_p10 }
  0x5d   : > { %p1630_p4 = pnand %p1629_p2, %p1623_p11 }
  0x5f   : > { %1633 = shalt.err (!%p1630_p4)
}
  0x60   : > { %1400 = dma.hbm_to_vmem [thread:$0]  (!%p1908_p7), %s1915_s19, 64, %s345_s14, %s334_s16  }
  0x61   : > { %353 = sbr.rel (%p1843_p8) target bundleno = 1492 (0x5d4), region = 52  ;;  %s1934_s2 = sand.u32 (!%p1843_p8), 1, %s1710_s28  }
  0x62   : > { %s1239_s12 = sshll.u32 (!%p1843_p8), %s1934_s2, 2  ;;  %s356_s22 = scalar_lea.sflag (!%p1843_p8), [#allocation3], %s1934_s2 }
  0x63   : > { %s359_s23 = scalar_lea.vmem (!%p1843_p8), [#allocation2], %s1239_s12  ;;  %p2122_p1 = scmp.ne.s32.totalorder (!%p1843_p8), %s2109_s13, 0 }
  0x66   : > { %1685 = dma.done.wait (%p2122_p1), %s356_s22, 64  }
  0x67   : > { %1687 = vsyncadd (%p2122_p1), %s356_s22, 4294967232  ;;  %s364_s4 = sand.u32 1, %s1824_s11   ;;  %s368_s15 = scalar_lea.vmem [#allocation5], %s1239_s12 }
  0x68   : > { %s365_s19 = scalar_lea.sflag [#allocation6], %s364_s4 }
  0x69   : > { %1689 = dma.done.wait (%p2122_p1), %s365_s19, 64  }
  0x6a   : > { %1691 = vsyncadd (%p2122_p1), %s365_s19, 4294967232  ;;  %p2123_p8 = scmp.eq.s32.totalorder %s1824_s11, 0 }
  0x6c   : > { %1693 = dma.done.wait (%p2123_p8), [#allocation6], 256   ;;  %p2124_p7 = pmov %p2123_p8 }
  0x6e   : > { %1695 = vsyncadd (%p2124_p7), [#allocation6], 4294967040  ;;  %p2125_p6 = pmov %p2124_p7 }
  0x70   : > { %1697 = dma.done.wait (%p2125_p6), [#allocation9], 512   ;;  %p2126_p12 = pmov %p2125_p6 }
  0x71   : > { %v1735_v0 = vmov 0.0   ;;  %vm1736_vm0 = vmmov 0   ;;  %v1478_v1 = vld [vmem:[#allocation8 + $0x8] sm:$0xff]   ;;  %v1479_v2 = vld [vmem:[#allocation7 + $0x8] sm:$0xff]   ;;  %v1480_v3 = vld [vmem:[#allocation8] sm:$0xff]   ;;  %vm444_vm1 = vcmask 261120  }
  0x72   : > { %1699 = vsyncadd (%p2126_p12), [#allocation9], 4294966784  ;;  %1302 = vmatprep.subr.bf16.mxu1 %v1735_v0  ;;  %1294 = vmatprep.subr.bf16.mxu0 %v1735_v0  ;;  %v1481_v4 = vld [vmem:[#allocation7] sm:$0xff]   ;;  %v420_v5 = vld [vmem:[%s368_s15] sm:$0xf]  ;;  %vm556_vm2 = vcmask 64512  }
  0x73   : > { %1306 = vmatprep.mubr.msk.bf16.mxu1 %vm1736_vm0, %v1735_v0  ;;  %1298 = vmatprep.mubr.msk.bf16.mxu0 %vm1736_vm0, %v1735_v0  ;;  %v419_v6 = vld [vmem:[%s359_s23] sm:$0xf]  ;;  %s1737_s6 = smov 112   ;;  %s1738_s14 = smov 120   ;;  %vm621_vm3 = vcmask 1043456   ;;  %vm1009_vm4 = vcmask 130048  }
  0x74   : > { %1303 = vmatpush3.bf16.msra.mxu1 %v1478_v1  ;;  %1295 = vmatpush3.bf16.msra.mxu0 %v1479_v2  ;;  %v1249_v7 = vld [vmem:[%s2097_s5] ss:$0 sm:$0xff]  ;;  %s1739_s16 = smov 104   ;;  %s1740_s24 = smov 96   ;;  %vm1011_vm5 = vcmask 195584  }
  0x75   : > { %1304 = vmatprep.subr.bf16.mxu1 %v1735_v0  ;;  %1296 = vmatprep.subr.bf16.mxu0 %v1735_v0  ;;  %v1245_v8 = vld [vmem:[%s2095_s3] ss:$0 sm:$0xff]  ;;  %s1741_s17 = smov 80   ;;  %s1742_s26 = smov 72  }
  0x76   : > { %s1743_s0 = smov 88   ;;  %s1744_s12 = smov 8  }
  0x77   : > { %s1745_s22 = smov 16   ;;  %s1746_s23 = smov 24  }
  0x78   : > { %1305 = vmatpush3.bf16.msra.mxu1 %v1480_v3  ;;  %1297 = vmatpush3.bf16.msra.mxu0 %v1481_v4  ;;  %s1244_s4 = sshll.u32 %s1934_s2, 3  ;;  %s1266_s11 = sshll.u32 %s1718_s30, 7 }
  0x79   : > { %1316 = vmatprep.subr.bf16.mxu1 %v1735_v0  ;;  %1310 = vmatprep.subr.bf16.mxu0 %v1735_v0  ;;  %s417_s13 = scalar_lea.vmem [#allocation11], %s1244_s4 }
  0x7a   : > { %s1096_s20 = sshll.u32 %s417_s13, 4  ;;  %s2045_s20 = int_to_ptr.vmem [resolvable:$true] %s1096_s20 }
  0x7b   : > { %1307 = vmatmul.mubr.msk.bf16.vlgmr.msra.gmra.mxu1 %vm444_vm1, %v420_v5  ;;  %1299 = vmatmul.mubr.msk.bf16.vlgmr.msra.gmra.mxu0 %vm444_vm1, %v419_v6  ;;  %s1634_s30 = scalar_lea.vmem %s2045_s20, 128 }
  0x7c   : > { %1318 = vmatprep.mubr.msk.bf16.mxu1 %vm1736_vm0, %v1735_v0  ;;  %1312 = vmatprep.mubr.msk.bf16.mxu0 %vm1736_vm0, %v1735_v0  ;;  %p1635_p0 = scmp.ne.s32.totalorder %s2045_s20, %s1634_s30 }
  0x7e   : > { %p1636_p3 = pnand %p1635_p0, %p1889_p5 }
  0x80   : > { %p1637_p10 = pneg %p1636_p3 }
 0x13b   : > { %v549_v9 = vpop.f32.mrf.mxu1  ;;  %v482_v11 = vpop.f32.mrf.mxu0 }
 0x13c   : > { %v550_v10 = vadd.f32 %v1249_v7, %v549_v9  ;;  %v483_v12 = vadd.f32 %v1245_v8, %v482_v11 }
 0x13d   : > { %v1308_v13 = vpop.f32.mrf.mxu1  ;;  %v1300_v15 = vpop.f32.mrf.mxu0 }
 0x13e   : > { %v1977_v14 = vpack.c.bf16 %v550_v10, %v550_v10  ;;  %v488_v17 = vpack.c.bf16 %v483_v12, %v483_v12 }
 0x13f   : > { %v552_v16 = vpop.f32.mrf.mxu1  ;;  %v485_v18 = vpop.f32.mrf.mxu0 }
 0x140   : > { %778 = vrot.lane.b32.xlu1 %v1977_v14, %s1737_s6  ;;  %668 = vrot.lane.b32.xlu0 %v1977_v14, %s1738_s14  ;;  %v561_v19 = vsel %vm556_vm2, %v1977_v14, 0 }
 0x141   : > { %v1309_v20 = vpop.f32.mrf.mxu1  ;;  %1311 = vmatpush3.bf16.xpose.msra.mxu0 %v561_v19  ;;  %v1301_v21 = vpop.f32.mrf.mxu0 }
 0x142   : > { %1322 = vmatprep.subr.bf16.mxu0 %v1735_v0 }
 0x144   : > { %776 = vrot.lane.b32.xlu1 %v488_v17, %s1737_s6  ;;  %666 = vrot.lane.b32.xlu0 %v488_v17, %s1738_s14  ;;  %s2043_s14 = scalar_lea.hbm %s2100_s8, %s1266_s11 }
 0x148   : > { %886 = vrot.lane.b32.xlu1 %v488_v17, %s1739_s16  ;;  %888 = vrot.lane.b32.xlu0 %v1977_v14, %s1739_s16  ;;  %s1082_s16 = scalar_lea.sflag [#allocation4], %s1934_s2 }
 0x149   : > { %1313 = vmatmul.mubr.msk.bf16.vlgmr.msra.gmra.mxu0 %vm556_vm2, %v488_v17 }
 0x14a   : > { %1324 = vmatprep.mubr.msk.bf16.mxu0 %vm1736_vm0, %v1735_v0 }
 0x1b2   : > { %v669_v22 = vpop.permute.xlu0 %668  ;;  %v779_v24 = vpop.permute.xlu1 %778 }
 0x1b3   : > { %v674_v23 = vsel %vm556_vm2, %v669_v22, 0  ;;  %v784_v26 = vsel %vm556_vm2, %v779_v24, 0 }
 0x1b4   : > { %1323 = vmatpush3.bf16.xpose.msra.mxu0 %v674_v23 }
 0x1b5   : > { %1334 = vmatprep.subr.bf16.mxu0 %v1735_v0 }
 0x1b6   : > { %v667_v25 = vpop.permute.xlu0 %666  ;;  %v777_v28 = vpop.permute.xlu1 %776 }
 0x1ba   : > { %v889_v27 = vpop.permute.xlu0 %888  ;;  %v887_v30 = vpop.permute.xlu1 %886 }
 0x1bb   : > { %1325 = vmatmul.mubr.msk.bf16.vlgmr.msra.gmra.mxu0 %vm556_vm2, %v667_v25  ;;  %v894_v29 = vsel %vm556_vm2, %v889_v27, 0 }
 0x1bc   : > { %1335 = vmatpush3.bf16.xpose.msra.mxu0 %v784_v26  ;;  %1336 = vmatprep.mubr.msk.bf16.mxu0 %vm1736_vm0, %v1735_v0 }
 0x1bd   : > { %1346 = vmatprep.subr.bf16.mxu0 %v1735_v0 }
 0x1c3   : > { %1337 = vmatmul.mubr.msk.bf16.vlgmr.msra.gmra.mxu0 %vm556_vm2, %v777_v28 }
 0x1c4   : > { %1347 = vmatpush3.bf16.xpose.msra.mxu0 %v894_v29  ;;  %1348 = vmatprep.mubr.msk.bf16.mxu0 %vm1736_vm0, %v1735_v0 }
 0x1c5   : > { %1358 = vmatprep.subr.bf16.mxu0 %v1735_v0 }
 0x1cb   : > { %1349 = vmatmul.mubr.msk.bf16.vlgmr.msra.gmra.mxu0 %vm556_vm2, %v887_v30 }
 0x1cc   : > { %1362 = vmatprep.mubr.msk.bf16.mxu0 %vm1736_vm0, %v1735_v0 }
 0x209   : > { %v597_v31 = vpop.f32.mrf.mxu0 }
 0x20a   : > { %v603_v32 = vsel %vm556_vm2, %v597_v31, -inf }
 0x20b   : > { %604 = vmax.xlane.f32.xlu0 %v603_v32  ;;  %v1314_v33 = vpop.f32.mrf.mxu0 }
 0x20d   : > { %v600_v34 = vpop.f32.mrf.mxu0 }
 0x20f   : > { %v1315_v35 = vpop.f32.mrf.mxu0 }
 0x27b   : > { %v710_v36 = vpop.f32.mrf.mxu0 }
 0x27c   : > { %v716_v37 = vsel %vm556_vm2, %v710_v36, -inf }
 0x27d   : > { %717 = vmax.xlane.f32.xlu1 %v716_v37  ;;  %v1326_v38 = vpop.f32.mrf.mxu0 }
 0x27f   : > { %v713_v39 = vpop.f32.mrf.mxu0 }
 0x280   : > { %v1483_v39 = vld [vmem:[#allocation10] sm:$0xff]  }
 0x281   : > { %v1327_v40 = vpop.f32.mrf.mxu0 }
 0x283   : > { %v820_v41 = vpop.f32.mrf.mxu0 }
 0x284   : > { %v826_v42 = vsel %vm556_vm2, %v820_v41, -inf }
 0x285   : > { %827 = vmax.xlane.f32.xlu0 %v826_v42  ;;  %v1338_v43 = vpop.f32.mrf.mxu0 }
 0x287   : > { %v823_v44 = vpop.f32.mrf.mxu0 }
 0x289   : > { %v1339_v45 = vpop.f32.mrf.mxu0 }
 0x28b   : > { %v930_v46 = vpop.f32.mrf.mxu0 }
 0x28c   : > { %v936_v47 = vsel %vm556_vm2, %v930_v46, -inf }
 0x28d   : > { %937 = vmax.xlane.f32.xlu0 %v936_v47  ;;  %v1350_v48 = vpop.f32.mrf.mxu0 }
 0x28f   : > { %v933_v49 = vpop.f32.mrf.mxu0 }
 0x291   : > { %v1351_v50 = vpop.f32.mrf.mxu0 }
 0x294   : > { %v605_v51 = vpop.xlane.xlu0 %604 }
 0x295   : > { %v606_v52 = vsub.f32 %v597_v31, %v605_v51 }
 0x297   : > { %v607_v53 = vmul.f32 1.442695, %v606_v52 }
 0x299   : > { %1484 = vpow2.f32 %v607_v53 }
 0x2a6   : > { %v1485_v54 = vpop.eup %1484 }
 0x2a7   : > { %v609_v55 = vsel %vm556_vm2, %v1485_v54, 0.0 }
 0x2a8   : > { %610 = vadd.xlane.f32.xlu1 %v609_v55 }
 0x2b9   : > { %616 = vrot.lane.b32.xlu1 %v1977_v14, %s1740_s24  ;;  %s1747_s24 = smov [#allocation11]  }
 0x306   : > { %v718_v56 = vpop.xlane.xlu1 %717 }
 0x307   : > { %v719_v57 = vsub.f32 %v710_v36, %v718_v56  ;;  %v1482_v36 = vld [vmem:[#allocation10 + $0x8] sm:$0xff]   ;;  %v1261_v56 = vld [vmem:[%s2099_s7] ss:$0 sm:$0xff] }
 0x308   : > { %1359 = vmatpush3.bf16.msra.mxu0 %v1482_v36 }
 0x309   : > { %v720_v58 = vmul.f32 1.442695, %v719_v57  ;;  %1360 = vmatprep.subr.bf16.mxu0 %v1735_v0 }
 0x30b   : > { %1486 = vpow2.f32 %v720_v58 }
 0x30c   : > { %1361 = vmatpush3.bf16.msra.mxu0 %v1483_v39 }
 0x30e   : > { %v828_v59 = vpop.xlane.xlu0 %827 }
 0x30f   : > { %v829_v60 = vsub.f32 %v820_v41, %v828_v59 }
 0x311   : > { %v830_v61 = vmul.f32 1.442695, %v829_v60 }
 0x313   : > { %1488 = vpow2.f32 %v830_v61 }
 0x316   : > { %v938_v62 = vpop.xlane.xlu0 %937 }
 0x317   : > { %v939_v63 = vsub.f32 %v930_v46, %v938_v62 }
 0x318   : > { %v1487_v1 = vpop.eup %1486 }
 0x319   : > { %v940_v2 = vmul.f32 1.442695, %v939_v63  ;;  %v722_v3 = vsel %vm556_vm2, %v1487_v1, 0.0 }
 0x31a   : > { %723 = vadd.xlane.f32.xlu0 %v722_v3 }
 0x31b   : > { %1490 = vpow2.f32 %v940_v2 }
 0x320   : > { %v1489_v4 = vpop.eup %1488 }
 0x321   : > { %v832_v5 = vsel %vm556_vm2, %v1489_v4, 0.0 }
 0x322   : > { %833 = vadd.xlane.f32.xlu1 %v832_v5 }
 0x328   : > { %v1491_v6 = vpop.eup %1490 }
 0x329   : > { %v942_v7 = vsel %vm556_vm2, %v1491_v6, 0.0 }
 0x32a   : > { %943 = vadd.xlane.f32.xlu0 %v942_v7 }
 0x331   : > { %v611_v8 = vpop.xlane.xlu1 %610 }
 0x332   : > { %1492 = vrcp.f32 %v611_v8 }
 0x333   : > { %838 = vrot.lane.b32.xlu1 %v1977_v14, %s1741_s17  ;;  %s1638_s17 = sshll.u32 %s1747_s24, 4  ;;  %s1639_s17 = int_to_ptr.vmem [resolvable:$false] %s1638_s17 }
 0x334   : > { %p1641_p11 = scmp.lt.s32.totalorder %s2045_s20, %s1639_s17 }
 0x335   : > { %v617_v9 = vpop.permute.xlu1 %616 }
 0x336   : > { %v623_v10 = vsel %vm621_vm3, %v617_v9, 0 }
 0x337   : > { %1317 = vmatpush3.bf16.msra.mxu1 %v623_v10  ;;  %948 = vrot.lane.b32.xlu1 %v1977_v14, %s1742_s26  ;;  %s1640_s26 = scalar_lea.vmem %s1639_s17, 256 }
 0x338   : > { %1328 = vmatprep.subr.bf16.mxu1 %v1735_v0  ;;  %p1642_p9 = scmp.lt.s32.totalorder %s1640_s26, %s1634_s30 }
 0x33a   : > { %p1643_p13 = por %p1642_p9, %p1641_p11 }
 0x33c   : > { %p1644_p2 = pnand %p1643_p13, %p1637_p10 }
 0x33f   : > { %v1493_v11 = vpop.eup %1492 }
 0x340   : > { %728 = vrot.lane.b32.xlu0 %v1977_v14, %s1743_s0  ;;  %v613_v12 = vmul.f32 %v1493_v11, %v1485_v54 }
 0x342   : > { %v614_v13 = vpack.c.bf16 %v613_v12, %v613_v12 }
 0x344   : > { %1319 = vmatmul.mubr.msk.bf16.vlgmr.msra.gmra.mxu1 %vm556_vm2, %v614_v13 }
 0x345   : > { %1330 = vmatprep.mubr.msk.bf16.mxu1 %vm1736_vm0, %v1735_v0 }
 0x3a3   : > { %v724_v15 = vpop.xlane.xlu0 %723 }
 0x3a4   : > { %1494 = vrcp.f32 %v724_v15 }
 0x3ab   : > { %v834_v16 = vpop.xlane.xlu1 %833 }
 0x3ac   : > { %1496 = vrcp.f32 %v834_v16 }
 0x3af   : > { %v839_v22 = vpop.permute.xlu1 %838 }
 0x3b0   : > { %v844_v24 = vsel %vm621_vm3, %v839_v22, 0 }
 0x3b1   : > { %v1495_v17 = vpop.eup %1494 }
 0x3b2   : > { %v726_v19 = vmul.f32 %v1495_v17, %v1487_v1 }
 0x3b3   : > { %v944_v18 = vpop.xlane.xlu0 %943  ;;  %v949_v26 = vpop.permute.xlu1 %948 }
 0x3b4   : > { %1498 = vrcp.f32 %v944_v18  ;;  %v727_v14 = vpack.c.bf16 %v726_v19, %v726_v19  ;;  %v954_v29 = vsel %vm621_vm3, %v949_v26, 0 }
 0x3b7   : > { %v729_v20 = vpop.permute.xlu0 %728 }
 0x3b8   : > { %v734_v21 = vsel %vm621_vm3, %v729_v20, 0 }
 0x3b9   : > { %1329 = vmatpush3.bf16.msra.mxu1 %v734_v21  ;;  %v1497_v23 = vpop.eup %1496 }
 0x3ba   : > { %1340 = vmatprep.subr.bf16.mxu1 %v1735_v0  ;;  %v836_v25 = vmul.f32 %v1497_v23, %v1489_v4 }
 0x3bc   : > { %1331 = vmatmul.mubr.msk.bf16.vlgmr.msra.gmra.mxu1 %vm556_vm2, %v727_v14  ;;  %v837_v27 = vpack.c.bf16 %v836_v25, %v836_v25 }
 0x3bd   : > { %1341 = vmatpush3.bf16.msra.mxu1 %v844_v24  ;;  %1342 = vmatprep.mubr.msk.bf16.mxu1 %vm1736_vm0, %v1735_v0 }
 0x3be   : > { %1352 = vmatprep.subr.bf16.mxu1 %v1735_v0 }
 0x3c1   : > { %v1499_v28 = vpop.eup %1498 }
 0x3c2   : > { %v946_v30 = vmul.f32 %v1499_v28, %v1491_v6 }
 0x3c4   : > { %1343 = vmatmul.mubr.msk.bf16.vlgmr.msra.gmra.mxu1 %vm556_vm2, %v837_v27  ;;  %v947_v31 = vpack.c.bf16 %v946_v30, %v946_v30 }
 0x3c5   : > { %1353 = vmatpush3.bf16.msra.mxu1 %v954_v29  ;;  %1354 = vmatprep.mubr.msk.bf16.mxu1 %vm1736_vm0, %v1735_v0 }
 0x3cc   : > { %1355 = vmatmul.mubr.msk.bf16.vlgmr.msra.gmra.mxu1 %vm556_vm2, %v947_v31 }
 0x404   : > { %v659_v32 = vpop.f32.mrf.mxu1 }
 0x406   : > { %v1320_v33 = vpop.f32.mrf.mxu1 }
 0x408   : > { %v662_v34 = vpop.f32.mrf.mxu1 }
 0x40a   : > { %v1321_v35 = vpop.f32.mrf.mxu1 }
 0x47c   : > { %v770_v37 = vpop.f32.mrf.mxu1 }
 0x47d   : > { %997 = vrot.lane.b32.xlu0 %v770_v37, %s1744_s12 }
 0x47e   : > { %v1332_v38 = vpop.f32.mrf.mxu1 }
 0x480   : > { %v773_v40 = vpop.f32.mrf.mxu1 }
 0x482   : > { %v1333_v41 = vpop.f32.mrf.mxu1 }
 0x484   : > { %v880_v42 = vpop.f32.mrf.mxu1 }
 0x485   : > { %1001 = vrot.lane.b32.xlu1 %v880_v42, %s1745_s22 }
 0x486   : > { %v1344_v43 = vpop.f32.mrf.mxu1 }
 0x488   : > { %v883_v44 = vpop.f32.mrf.mxu1 }
 0x48a   : > { %v1345_v45 = vpop.f32.mrf.mxu1 }
 0x48c   : > { %v990_v46 = vpop.f32.mrf.mxu1 }
 0x48d   : > { %1005 = vrot.lane.b32.xlu0 %v990_v46, %s1746_s23 }
 0x48e   : > { %v1356_v0 = vpop.f32.mrf.mxu1 }
 0x490   : > { %v993_v47 = vpop.f32.mrf.mxu1 }
 0x492   : > { %v1357_v48 = vpop.f32.mrf.mxu1 }
 0x4ef   : > { %v998_v49 = vpop.permute.xlu0 %997 }
 0x4f0   : > { %v1008_v51 = vsel %vm556_vm2, %v659_v32, %v998_v49 }
 0x4f7   : > { %v1002_v50 = vpop.permute.xlu1 %1001 }
 0x4f8   : > { %v1010_v52 = vsel %vm1009_vm4, %v1008_v51, %v1002_v50 }
 0x4ff   : > { %v1006_v53 = vpop.permute.xlu0 %1005 }
 0x500   : > { %v1012_v54 = vsel %vm1011_vm5, %v1010_v52, %v1006_v53 }
 0x501   : > { %v1013_v55 = vpack.c.bf16 %v1012_v54, %v1012_v54 }
 0x503   : > { %1363 = vmatmul.mubr.msk.bf16.vlgmr.msra.gmra.mxu0 %vm444_vm1, %v1013_v55 }
 0x5c3   : > { %v1074_v57 = vpop.f32.mrf.mxu0 }
 0x5c4   : > { %v1075_v58 = vadd.f32 %v1261_v56, %v1074_v57 }
 0x5c5   : > { %v1364_v59 = vpop.f32.mrf.mxu0 }
 0x5c6   : > { %1080 = vst.msk [vmem:[%s417_s13] sm:$0xff] %vm444_vm1, %v1075_v58 }
 0x5c7   : > { %v1077_v60 = vpop.f32.mrf.mxu0 }
 0x5c8   : > { %1647 = shalt.err (!%p1644_p2)
}
 0x5c9   : > { %s1648_s0 = scalar_lea.hbm %s2043_s14, 128  ;;  %s1652_s22 = scalar_lea.hbm %s2100_s8, 256 }
 0x5ca   : > { %p1649_p4 = scmp.ne.s32.totalorder %s2043_s14, %s1648_s0  ;;  %p1653_p7 = scmp.lt.s32.totalorder %s2043_s14, %s2100_s8 }
 0x5cb   : > { %p1654_p6 = scmp.lt.s32.totalorder %s1652_s22, %s1648_s0 }
 0x5cc   : > { %p1650_p1 = pnand %p1649_p4, %p1889_p5 }
 0x5cd   : > { %p1655_p12 = por %p1654_p6, %p1653_p7 }
 0x5ce   : > { %p1651_p8 = pneg %p1650_p1 }
 0x5d0   : > { %p1656_p0 = pnand %p1655_p12, %p1651_p8 }
 0x5d2   : > { %1659 = shalt.err (!%p1656_p0)
}
 0x5d3   : > { %1382 = dma.vmem_to_hbm [thread:$0]  (%p1889_p5), %s2045_s20, 128, %s2043_s14, %s1082_s16   ;;  %v1365_v61 = vpop.f32.mrf.mxu0 }
 0x5d4 PF: > { %s2127_s19 = sld [smem:[#allocation17_spill]]  ;;  %s1108_s15 = sand.u32 1, %s1706_s27  }
 0x5d5   : > { %p2129_p10 = scmp.ge.s32.totalorder %s1726_s10, 2  ;;  %s1109_s11 = scalar_lea.sflag [#allocation4], %s1108_s15 }
 0x5da   : > { %p2128_p3 = scmp.ne.s32.totalorder %s2127_s19, 0 }
 0x5dc   : > { %p1402_p11 = pnand %p2129_p10, %p2128_p3 }
 0x5de   : > { %p1403_p9 = pneg %p1402_p11 }
 0x5e0   : > { %1701 = dma.done.wait (%p1403_p9), %s1109_s11, 128  }
 0x5e1   : > { %1703 = vsyncadd (%p1403_p9), %s1109_s11, 4294967168  ;;  %s28_s10 = sadd.s32 1, %s1726_s10   ;;  %s2130_s18 = sld [smem:[#allocation18_spill]] }
 0x5e2   : > { %p25_p13 = scmp.ge.s32.totalorder %s28_s10, 4   ;;  %s2131_s27 = smov %s1710_s28 }
 0x5e3   : > { %s2132_s28 = smov %s1714_s29  ;;  %s2133_s29 = smov %s1901_s25 }
 0x5e4   : > { %s2134_s30 = smov %s1722_s9  ;;  %27 = sbr.rel (!%p25_p13) target bundleno = 14 (0xe), region = 122 }
 0x5e7   : > { %s2135_s9 = smov %s2130_s18 }
 0x5e9   :  { %1114 = vsyncpa [#allocation3], 1 }
 0x5ea   :  { %1116 = vsyncpa [#allocation3 + $0x1], 1 }
 0x5eb   :  { %1117 = vsyncpa [#allocation6], 1 }
 0x5ec   :  { %1119 = vsyncpa [#allocation6 + $0x1], 1 }
 0x5ed   :  { %1120 = vsyncpa [#allocation9], 1 }
 0x5ee   :  { %1121 = vsyncpa [#allocation4], 1 }
 0x5ef   :  { %1123 = vsyncpa [#allocation4 + $0x1], 1 }

</bundles_post_ra>
